<compile_context>
chip_gen: v7x
topology: tpu7x:2x2x1
jax: 0.10.0
libtpu: 0.0.40
codegen_flags: <defaults>
</compile_context>

<pallas_src>
import jax
import jax.numpy as jnp
from jax.experimental import pallas as pl
from jax.experimental.pallas import tpu as pltpu


def _leaky_relu(x, slope=0.01):
    # matches torch.nn.LeakyReLU(negative_slope=0.01)
    return jnp.where(x > 0, x, slope * x)


# --------------------------- Pallas kernel ---------------------------------
def _tte_kernel(tseq_ref,   # SMEM (B,) int32        -- scalar prefetch
                pe4_ref,    # VMEM (B, Lb, 4)        last-4 place features (L block)
                tb_ref,     # VMEM (B, 1, K)         hoisted time@W_time + bias term
                w_ref,      # VMEM (T, 4, K)         place-half of time_emb_weights (resident)
                out_ref):   # VMEM (B, Lb, K)
    B, Lb, _ = pe4_ref.shape
    K = out_ref.shape[2]

    # B is small & static: Python unroll, everything stays in vregs.
    for b in range(B):
        w = w_ref[tseq_ref[b]]          # (4, K) gathered weight tile (dynamic leading index)
        x = pe4_ref[b]                  # (Lb, 4)
        y = jnp.broadcast_to(tb_ref[b], (Lb, K))        # L-independent term, broadcast once
        # depth-4 contraction as unrolled VPU broadcast-FMAs (exact f32, no MXU)
        for i in range(4):
            y = y + x[:, i:i + 1] * w[i:i + 1, :]       # (Lb,1)*(1,K) -> (Lb,K)
        out_ref[b] = _leaky_relu(y).astype(out_ref.dtype)


# --------------------------- wrapper ----------------------------------------
def transition_time_embedding_forward(place_embedding, transition_seq, time_seq,
                                      time_emb_weights, time_emb_bias,
                                      *, block_l=None, force_pallas=False):
    """place_embedding (B,L,K+4) f32, transition_seq (B,) int, time_seq (B,4) f32
       -> (B, L, K) f32, matching the PyTorch module output."""
    B, L, Dp = place_embedding.shape
    T, eight, K = time_emb_weights.shape
    assert eight == 8 and Dp >= 4

    # Small-shape bypass: below ~64K output elements the fixed pallas_call +
    # DMA prologue latency dominates and plain XLA fusion matches/beats it.
    if not force_pallas and B * L * K < (1 << 16):
        return reference_forward(place_embedding, transition_seq, time_seq,
                                 time_emb_weights, time_emb_bias)

    # Clamp indices: VMEM dynamic indexing has no runtime bounds check.
    tseq = jnp.clip(transition_seq.astype(jnp.int32), 0, T - 1)

    # Pre-slice the last-4 place features (cuts that operand's DMA ~9x and
    # removes the unaligned lane select from the kernel body).
    pe4 = place_embedding[:, :, Dp - 4:]                          # (B, L, 4)
    w_place = time_emb_weights[:, 4:, :]                          # (T, 4, K)

    # Hoist the L-independent term: (time_seq @ W_time[tseq]) + bias[tseq].
    w_time_g = time_emb_weights[tseq, :4, :]                      # (B, 4, K)
    tb = jnp.einsum('bi,bik->bk', time_seq, w_time_g,
                    precision='highest') + time_emb_bias[tseq]    # (B, K)
    tb = tb[:, None, :]                                           # (B, 1, K)

    # L tiling: full L when small, else 512-row blocks (sublane-multiple) so
    # inputs/outputs double-buffer under the scoped VMEM limit on all chips
    # (incl. v7x's 64 MiB).  Partial trailing blocks are masked by Pallas.
    if block_l is None:
        block_l = L if L <= 512 else 512
    grid_l = pl.cdiv(L, block_l)

    cost = pl.CostEstimate(
        flops=2 * B * L * 4 * K + 2 * B * L * K,
        transcendentals=0,
        bytes_accessed=4 * (pe4.size + tb.size + w_place.size + B * L * K),
    )

    # TODO(synk): K=32 keeps every output vreg 3/4 empty (masked vst); a
    # lane-dense layout would need K to be a multiple of 128 or a caller-side
    # fold of L into the last axis, which would change the module's contract.
    return pl.pallas_call(
        _tte_kernel,
        out_shape=jax.ShapeDtypeStruct((B, L, K), jnp.float32),
        grid_spec=pltpu.PrefetchScalarGridSpec(
            num_scalar_prefetch=1,                       # transition_seq -> SMEM
            grid=(grid_l,),
            in_specs=[
                pl.BlockSpec((B, block_l, 4), lambda i, s: (0, i, 0)),  # pe last-4 (tiled)
                pl.BlockSpec((B, 1, K),       lambda i, s: (0, 0, 0)),  # hoisted term (resident)
                pl.BlockSpec((T, 4, K),       lambda i, s: (0, 0, 0)),  # weight table (resident)
            ],
            out_specs=pl.BlockSpec((B, block_l, K), lambda i, s: (0, i, 0)),
        ),
        compiler_params=pltpu.CompilerParams(
            dimension_semantics=("parallel",)),          # independent L blocks (megacore on v7x)
        cost_estimate=cost,
    )(tseq, pe4, tb, w_place)


# ---------------- pure-JAX reference (mirrors the PyTorch forward) ----------
def reference_forward(place_embedding, transition_seq, time_seq, weights, bias):
    B, L, Dp = place_embedding.shape
    tf = jnp.concatenate(
        [jnp.broadcast_to(time_seq[:, None, :], (B, L, 4)),
         place_embedding[:, :, -4:]], axis=2)                     # (B, L, 8)
    W1 = weights[transition_seq]                                  # (B, 8, K)
    b1 = bias[transition_seq]                                     # (B, K)
    out = jnp.einsum('bti,bid->btd', tf, W1,
                     precision='highest') + b1[:, None, :]
    return _leaky_relu(out)


if __name__ == "__main__":
    B = 2                       # batch
    L = 8                       # max_trace_len + 1
    dimension = 32              # K
    transition_num = 3          # T
    Dp = dimension + 4

    key = jax.random.PRNGKey(0)
    k_pe, k_t, k_seq, k_w1, k_b1 = jax.random.split(key, 5)

    place_embedding = jax.random.normal(k_pe, (B, L, Dp), jnp.float32)
    time_seq = jax.random.normal(k_t, (B, 4), jnp.float32)
    transition_seq = jax.random.randint(k_seq, (B,), 0, transition_num, jnp.int32)

    # module parameters (PyTorch init: weights ~ randn, bias zeros); use a
    # non-zero bias here so the bias path is actually exercised.
    time_emb_weights = jax.random.normal(
        k_w1, (transition_num, 8, dimension), jnp.float32)
    time_emb_bias = 0.1 * jax.random.normal(
        k_b1, (transition_num, dimension), jnp.float32)

    # force_pallas=True so the demo exercises the kernel despite the tiny shape
    out = transition_time_embedding_forward(
        place_embedding, transition_seq, time_seq,
        time_emb_weights, time_emb_bias, force_pallas=True)
    out = jax.block_until_ready(out)

    ref = reference_forward(place_embedding, transition_seq, time_seq,
                            time_emb_weights, time_emb_bias)
    assert out.shape == (B, L, dimension), out.shape
    assert jnp.allclose(out, ref, rtol=1e-4, atol=1e-4), (out, ref)

    print("KERNEL_OK")
</pallas_src>

<mosaic_0001>
module attributes {stable_mosaic.version = 11 : i64} {
  func.func @_tte_kernel(%arg0: i32, %arg1: memref<2xi32, #tpu.memory_space<smem>>, %arg2: memref<2x8x4xf32, #tpu.memory_space<vmem>>, %arg3: memref<2x1x32xf32, #tpu.memory_space<vmem>>, %arg4: memref<3x4x32xf32, #tpu.memory_space<vmem>>, %arg5: memref<2x8x32xf32, #tpu.memory_space<vmem>>) attributes {dimension_semantics = [#tpu.dimension_semantics<parallel>], iteration_bounds = array<i64: 1>, scalar_prefetch = 1 : i64, scratch_operands = 0 : i64, tpu.core_type = #tpu.core_type<tc>, window_params = [{transform_indices = @transform_0, window_bounds = array<i64: 2, 8, 4>}, {pipeline_mode = #tpu.pipeline_mode<synchronous>, transform_indices = @transform_1, window_bounds = array<i64: 2, 1, 32>}, {pipeline_mode = #tpu.pipeline_mode<synchronous>, transform_indices = @transform_2, window_bounds = array<i64: 3, 4, 32>}, {transform_indices = @transform_3, window_bounds = array<i64: 2, 8, 32>}]} {
    %c0 = arith.constant 0 : index
    %0 = memref.load %arg1[%c0] : memref<2xi32, #tpu.memory_space<smem>>
    %1 = arith.index_cast %0 : i32 to index
    %c0_0 = arith.constant 0 : index
    %c0_1 = arith.constant 0 : index
    %2 = vector.load %arg4[%1, %c0_0, %c0_1] : memref<3x4x32xf32, #tpu.memory_space<vmem>>, vector<1x4x32xf32>
    %3 = vector.shape_cast %2 : vector<1x4x32xf32> to vector<4x32xf32>
    %c0_2 = arith.constant 0 : index
    %c0_3 = arith.constant 0 : index
    %c0_4 = arith.constant 0 : index
    %4 = vector.load %arg2[%c0_2, %c0_3, %c0_4] : memref<2x8x4xf32, #tpu.memory_space<vmem>>, vector<1x8x4xf32>
    %5 = vector.shape_cast %4 : vector<1x8x4xf32> to vector<8x4xf32>
    %c0_5 = arith.constant 0 : index
    %c0_6 = arith.constant 0 : index
    %c0_7 = arith.constant 0 : index
    %6 = vector.load %arg3[%c0_5, %c0_6, %c0_7] : memref<2x1x32xf32, #tpu.memory_space<vmem>>, vector<1x1x32xf32>
    %7 = vector.shape_cast %6 : vector<1x1x32xf32> to vector<1x32xf32>
    %8 = vector.shape_cast %7 : vector<1x32xf32> to vector<1x32xf32>
    %9 = vector.broadcast %8 : vector<1x32xf32> to vector<8x32xf32>
    %10 = vector.extract_strided_slice %5 {offsets = [0, 0], sizes = [8, 1], strides = [1, 1]} : vector<8x4xf32> to vector<8x1xf32>
    %11 = vector.extract_strided_slice %3 {offsets = [0, 0], sizes = [1, 32], strides = [1, 1]} : vector<4x32xf32> to vector<1x32xf32>
    %12 = vector.broadcast %10 : vector<8x1xf32> to vector<8x32xf32>
    %13 = vector.broadcast %11 : vector<1x32xf32> to vector<8x32xf32>
    %14 = arith.mulf %12, %13 : vector<8x32xf32>
    %15 = arith.addf %9, %14 : vector<8x32xf32>
    %16 = vector.extract_strided_slice %5 {offsets = [0, 1], sizes = [8, 1], strides = [1, 1]} : vector<8x4xf32> to vector<8x1xf32>
    %17 = vector.extract_strided_slice %3 {offsets = [1, 0], sizes = [1, 32], strides = [1, 1]} : vector<4x32xf32> to vector<1x32xf32>
    %18 = vector.broadcast %16 : vector<8x1xf32> to vector<8x32xf32>
    %19 = vector.broadcast %17 : vector<1x32xf32> to vector<8x32xf32>
    %20 = arith.mulf %18, %19 : vector<8x32xf32>
    %21 = arith.addf %15, %20 : vector<8x32xf32>
    %22 = vector.extract_strided_slice %5 {offsets = [0, 2], sizes = [8, 1], strides = [1, 1]} : vector<8x4xf32> to vector<8x1xf32>
    %23 = vector.extract_strided_slice %3 {offsets = [2, 0], sizes = [1, 32], strides = [1, 1]} : vector<4x32xf32> to vector<1x32xf32>
    %24 = vector.broadcast %22 : vector<8x1xf32> to vector<8x32xf32>
    %25 = vector.broadcast %23 : vector<1x32xf32> to vector<8x32xf32>
    %26 = arith.mulf %24, %25 : vector<8x32xf32>
    %27 = arith.addf %21, %26 : vector<8x32xf32>
    %28 = vector.extract_strided_slice %5 {offsets = [0, 3], sizes = [8, 1], strides = [1, 1]} : vector<8x4xf32> to vector<8x1xf32>
    %29 = vector.extract_strided_slice %3 {offsets = [3, 0], sizes = [1, 32], strides = [1, 1]} : vector<4x32xf32> to vector<1x32xf32>
    %30 = vector.broadcast %28 : vector<8x1xf32> to vector<8x32xf32>
    %31 = vector.broadcast %29 : vector<1x32xf32> to vector<8x32xf32>
    %32 = arith.mulf %30, %31 : vector<8x32xf32>
    %33 = arith.addf %27, %32 : vector<8x32xf32>
    %cst = arith.constant 0.000000e+00 : f32
    %34 = vector.broadcast %cst : f32 to vector<8x32xf32>
    %35 = arith.cmpf ogt, %33, %34 : vector<8x32xf32>
    %cst_8 = arith.constant 0.00999999977 : f32
    %36 = vector.broadcast %cst_8 : f32 to vector<8x32xf32>
    %37 = arith.mulf %36, %33 : vector<8x32xf32>
    %38 = arith.select %35, %33, %37 : vector<8x32xi1>, vector<8x32xf32>
    %c0_9 = arith.constant 0 : index
    %c0_10 = arith.constant 0 : index
    %c0_11 = arith.constant 0 : index
    %39 = vector.load %arg5[%c0_9, %c0_10, %c0_11] : memref<2x8x32xf32, #tpu.memory_space<vmem>>, vector<1x8x32xf32>
    %40 = vector.shape_cast %39 : vector<1x8x32xf32> to vector<8x32xf32>
    %41 = vector.shape_cast %38 : vector<8x32xf32> to vector<1x8x32xf32>
    tpu.vector_store %arg5[%c0_9, %c0_10, %c0_11], %41 {strides = array<i32>} : memref<2x8x32xf32, #tpu.memory_space<vmem>>, vector<1x8x32xf32>,
    %c1 = arith.constant 1 : index
    %42 = memref.load %arg1[%c1] : memref<2xi32, #tpu.memory_space<smem>>
    %43 = arith.index_cast %42 : i32 to index
    %c0_12 = arith.constant 0 : index
    %c0_13 = arith.constant 0 : index
    %44 = vector.load %arg4[%43, %c0_12, %c0_13] : memref<3x4x32xf32, #tpu.memory_space<vmem>>, vector<1x4x32xf32>
    %45 = vector.shape_cast %44 : vector<1x4x32xf32> to vector<4x32xf32>
    %c1_14 = arith.constant 1 : index
    %c0_15 = arith.constant 0 : index
    %c0_16 = arith.constant 0 : index
    %46 = vector.load %arg2[%c1_14, %c0_15, %c0_16] : memref<2x8x4xf32, #tpu.memory_space<vmem>>, vector<1x8x4xf32>
    %47 = vector.shape_cast %46 : vector<1x8x4xf32> to vector<8x4xf32>
    %c1_17 = arith.constant 1 : index
    %c0_18 = arith.constant 0 : index
    %c0_19 = arith.constant 0 : index
    %48 = vector.load %arg3[%c1_17, %c0_18, %c0_19] : memref<2x1x32xf32, #tpu.memory_space<vmem>>, vector<1x1x32xf32>
    %49 = vector.shape_cast %48 : vector<1x1x32xf32> to vector<1x32xf32>
    %50 = vector.shape_cast %49 : vector<1x32xf32> to vector<1x32xf32>
    %51 = vector.broadcast %50 : vector<1x32xf32> to vector<8x32xf32>
    %52 = vector.extract_strided_slice %47 {offsets = [0, 0], sizes = [8, 1], strides = [1, 1]} : vector<8x4xf32> to vector<8x1xf32>
    %53 = vector.extract_strided_slice %45 {offsets = [0, 0], sizes = [1, 32], strides = [1, 1]} : vector<4x32xf32> to vector<1x32xf32>
    %54 = vector.broadcast %52 : vector<8x1xf32> to vector<8x32xf32>
    %55 = vector.broadcast %53 : vector<1x32xf32> to vector<8x32xf32>
    %56 = arith.mulf %54, %55 : vector<8x32xf32>
    %57 = arith.addf %51, %56 : vector<8x32xf32>
    %58 = vector.extract_strided_slice %47 {offsets = [0, 1], sizes = [8, 1], strides = [1, 1]} : vector<8x4xf32> to vector<8x1xf32>
    %59 = vector.extract_strided_slice %45 {offsets = [1, 0], sizes = [1, 32], strides = [1, 1]} : vector<4x32xf32> to vector<1x32xf32>
    %60 = vector.broadcast %58 : vector<8x1xf32> to vector<8x32xf32>
    %61 = vector.broadcast %59 : vector<1x32xf32> to vector<8x32xf32>
    %62 = arith.mulf %60, %61 : vector<8x32xf32>
    %63 = arith.addf %57, %62 : vector<8x32xf32>
    %64 = vector.extract_strided_slice %47 {offsets = [0, 2], sizes = [8, 1], strides = [1, 1]} : vector<8x4xf32> to vector<8x1xf32>
    %65 = vector.extract_strided_slice %45 {offsets = [2, 0], sizes = [1, 32], strides = [1, 1]} : vector<4x32xf32> to vector<1x32xf32>
    %66 = vector.broadcast %64 : vector<8x1xf32> to vector<8x32xf32>
    %67 = vector.broadcast %65 : vector<1x32xf32> to vector<8x32xf32>
    %68 = arith.mulf %66, %67 : vector<8x32xf32>
    %69 = arith.addf %63, %68 : vector<8x32xf32>
    %70 = vector.extract_strided_slice %47 {offsets = [0, 3], sizes = [8, 1], strides = [1, 1]} : vector<8x4xf32> to vector<8x1xf32>
    %71 = vector.extract_strided_slice %45 {offsets = [3, 0], sizes = [1, 32], strides = [1, 1]} : vector<4x32xf32> to vector<1x32xf32>
    %72 = vector.broadcast %70 : vector<8x1xf32> to vector<8x32xf32>
    %73 = vector.broadcast %71 : vector<1x32xf32> to vector<8x32xf32>
    %74 = arith.mulf %72, %73 : vector<8x32xf32>
    %75 = arith.addf %69, %74 : vector<8x32xf32>
    %cst_20 = arith.constant 0.000000e+00 : f32
    %76 = vector.broadcast %cst_20 : f32 to vector<8x32xf32>
    %77 = arith.cmpf ogt, %75, %76 : vector<8x32xf32>
    %cst_21 = arith.constant 0.00999999977 : f32
    %78 = vector.broadcast %cst_21 : f32 to vector<8x32xf32>
    %79 = arith.mulf %78, %75 : vector<8x32xf32>
    %80 = arith.select %77, %75, %79 : vector<8x32xi1>, vector<8x32xf32>
    %c1_22 = arith.constant 1 : index
    %c0_23 = arith.constant 0 : index
    %c0_24 = arith.constant 0 : index
    %81 = vector.load %arg5[%c1_22, %c0_23, %c0_24] : memref<2x8x32xf32, #tpu.memory_space<vmem>>, vector<1x8x32xf32>
    %82 = vector.shape_cast %81 : vector<1x8x32xf32> to vector<8x32xf32>
    %83 = vector.shape_cast %80 : vector<8x32xf32> to vector<1x8x32xf32>
    tpu.vector_store %arg5[%c1_22, %c0_23, %c0_24], %83 {strides = array<i32>} : memref<2x8x32xf32, #tpu.memory_space<vmem>>, vector<1x8x32xf32>,
    return
  }
  func.func @transform_0(%arg0: i32, %arg1: memref<2xi32, #tpu.memory_space<smem>>) -> (i32, i32, i32) {
    %c0_i32 = arith.constant 0 : i32
    %c0_i32_0 = arith.constant 0 : i32
    %c0_i32_1 = arith.constant 0 : i32
    return %c0_i32, %arg0, %c0_i32_0 : i32, i32, i32
  }
  func.func @transform_1(%arg0: i32, %arg1: memref<2xi32, #tpu.memory_space<smem>>) -> (i32, i32, i32) {
    %c0_i32 = arith.constant 0 : i32
    %c0_i32_0 = arith.constant 0 : i32
    %c0_i32_1 = arith.constant 0 : i32
    %c0_i32_2 = arith.constant 0 : i32
    return %c0_i32, %c0_i32_0, %c0_i32_1 : i32, i32, i32
  }
  func.func @transform_2(%arg0: i32, %arg1: memref<2xi32, #tpu.memory_space<smem>>) -> (i32, i32, i32) {
    %c0_i32 = arith.constant 0 : i32
    %c0_i32_0 = arith.constant 0 : i32
    %c0_i32_1 = arith.constant 0 : i32
    %c0_i32_2 = arith.constant 0 : i32
    return %c0_i32, %c0_i32_0, %c0_i32_1 : i32, i32, i32
  }
  func.func @transform_3(%arg0: i32, %arg1: memref<2xi32, #tpu.memory_space<smem>>) -> (i32, i32, i32) {
    %c0_i32 = arith.constant 0 : i32
    %c0_i32_0 = arith.constant 0 : i32
    %c0_i32_1 = arith.constant 0 : i32
    return %c0_i32, %arg0, %c0_i32_0 : i32, i32, i32
  }
}

</mosaic_0001>

<bundles_post_ra>
// kernel: tpu_custom_call.1
= control target key start
LH: loop header
LB: loop body
LE: loop exit
PB: predicated region body
PF: predicated region fallthrough
CT: control target
= control target key end

     0   :  { %s285_s0 = inlined_call_operand.vmem [shape: s32[2], index: 0, kind: input, shape index: {}]   ;;  %s286_s1 = inlined_call_operand.vmem [shape: f32[2,8,4], index: 1, kind: input, shape index: {}]   ;;  %s287_s2 = inlined_call_operand.vmem [shape: f32[2,1,32], index: 2, kind: input, shape index: {}]   ;;  %s288_s3 = inlined_call_operand.vmem [shape: f32[3,4,32], index: 3, kind: input, shape index: {}]   ;;  %s289_s4 = inlined_call_operand.hbm [shape: f32[2,8,32], index: 4, kind: output, shape index: {}]  }
   0x1   :  { %s9_s17 = sshll.u32 %s285_s0, 4  ;;  %s10_s17 = int_to_ptr.vmem [resolvable:$true] %s9_s17 }
   0x2   :  { %s181_s18 = scalar_lea.vmem %s10_s17, 16  ;;  %p186_p1 = scmp.lt.s32.totalorder %s10_s17, %s10_s17 }
   0x3   :  { %p182_p0 = scmp.ne.s32.totalorder %s10_s17, %s181_s18  ;;  %p187_p2 = scmp.lt.s32.totalorder %s181_s18, %s181_s18 }
   0x5   :  { %p188_p3 = por %p187_p2, %p186_p1 }
   0x7   :  { %p189_p4 = pnand %p188_p3, %p182_p0 }
   0x9   :  { %192 = shalt.err (!%p189_p4)  }
   0xa   :  { %s219_s19 = smov [#allocation3]  }
   0xb   :  { %12 = dma.vmem_to_smem %s10_s17, 16, %s219_s19, [#allocation2] }
   0xc   :  { %215 = dma.done.wait [#allocation2], 16 }
   0xd   :  { %216 = vsyncadd [#allocation2], 4294967280 }
   0xe   :  { %14 = sfence }
   0xf   :  { %v26_v0 = vld [vmem:[%s286_s1] sm:$0xff]  ;;  %v220_v1 = vmov 1   ;;  %v221_v2 = vmov 0  }
  0x10   :  { %176 = vset.pattern.permute.xlu1 %v220_v1  ;;  %175 = vset.pattern.permute.xlu0 %v221_v2 }
  0x11   :  { %15 = vsyncpa [#allocation5], 0  ;;  %46 = vperm.xlu1 %176, %v26_v0   ;;  %36 = vperm.xlu0 %175, %v26_v0   ;;  %v164_v3 = vld [vmem:[%s286_s1 + $0x8] sm:$0xff]  ;;  %v222_v4 = vmov 2   ;;  %v223_v5 = vmov 3   ;;  %s22_s23 = sld [smem:[#allocation3]]  ;;  %v39_v6 = vlaneseq }
  0x12   :  { %s162_s24 = sld [smem:[#allocation3 + $0x1]]  ;;  %v166_v18 = vld [vmem:[%s287_s2 + $0x1] ss:$0 sm:$0xff]  ;;  %v161_v23 = vld [vmem:[%s287_s2] ss:$0 sm:$0xff]  ;;  %s224_s2 = smov [#allocation4]  }
  0x13   :  { %v40_v7 = vshrl.u32 %v39_v6, 7  ;;  %s145_s9 = sshll.u32 %s224_s2, 4  ;;  %vm78_vm0 = vcmask 261120   ;;  %s146_s9 = int_to_ptr.vmem [resolvable:$true] %s145_s9 }
  0x14   :  { %s193_s10 = scalar_lea.vmem %s146_s9, 256  ;;  %p198_p6 = scmp.lt.s32.totalorder %s146_s9, %s146_s9 }
  0x15   :  { %106 = vperm.xlu1 %176, %v164_v3   ;;  %96 = vperm.xlu0 %175, %v164_v3   ;;  %v41_v8 = vsub.s32 0, %v40_v7  ;;  %v51_v15 = vsub.s32 1, %v40_v7  ;;  %v61_v16 = vsub.s32 2, %v40_v7  ;;  %v71_v24 = vsub.s32 3, %v40_v7  ;;  %p194_p5 = scmp.ne.s32.totalorder %s146_s9, %s193_s10  ;;  %p199_p7 = scmp.lt.s32.totalorder %s193_s10, %s193_s10 }
  0x17   :  { %s160_s25 = sshll.u32 %s22_s23, 2  ;;  %p200_p8 = por %p199_p7, %p198_p6 }
  0x18   :  { %s163_s26 = sshll.u32 %s162_s24, 2  ;;  %s24_s28 = scalar_lea.vmem %s288_s3, %s160_s25 }
  0x19   :  { %178 = vset.pattern.permute.xlu1 %v222_v4  ;;  %177 = vset.pattern.permute.xlu0 %v222_v4  ;;  %s82_s5 = scalar_lea.vmem %s288_s3, %s163_s26  ;;  %v25_v9 = vld [vmem:[%s24_s28] sm:$0xf]  ;;  %p201_p9 = pnand %p200_p8, %p194_p5 }
  0x1a   :  { %116 = vperm.xlu1 %178, %v164_v3   ;;  %56 = vperm.xlu0 %177, %v26_v0   ;;  %v83_v10 = vld [vmem:[%s82_s5] sm:$0xf]  ;;  %v42_v13 = vrot.slane %v25_v9, %v41_v8  ;;  %v52_v25 = vrot.slane %v25_v9, %v51_v15  ;;  %v62_v28 = vrot.slane %v25_v9, %v61_v16 }
  0x1b   :  { %v102_v14 = vrot.slane %v83_v10, %v41_v8  ;;  %v112_v21 = vrot.slane %v83_v10, %v51_v15  ;;  %v122_v27 = vrot.slane %v83_v10, %v61_v16  ;;  %v72_v33 = vrot.slane %v25_v9, %v71_v24 }
  0x1c   :  { %v132_v34 = vrot.slane %v83_v10, %v71_v24 }
  0x1e   :  { %179 = vset.pattern.permute.xlu1 %v223_v5  ;;  %180 = vset.pattern.permute.xlu0 %v223_v5 }
  0x1f   :  { %66 = vperm.xlu1 %179, %v26_v0   ;;  %126 = vperm.xlu0 %180, %v164_v3  }
  0x90   :  { %v47_v11 = vpop.permute.xlu1 %46  ;;  %v37_v12 = vpop.permute.xlu0 %36 }
  0x91   :  { %v43_v20 = vmul.f32 %v42_v13, %v37_v12  ;;  %v53_v35 = vmul.f32 %v52_v25, %v47_v11 }
  0x93   :  { %v44_v29 = vadd.f32 %v161_v23, %v43_v20 }
  0x94   :  { %v107_v17 = vpop.permute.xlu1 %106  ;;  %v97_v19 = vpop.permute.xlu0 %96 }
  0x95   :  { %v103_v22 = vmul.f32 %v102_v14, %v97_v19  ;;  %v113_v30 = vmul.f32 %v112_v21, %v107_v17  ;;  %v54_v39 = vadd.f32 %v53_v35, %v44_v29 }
  0x97   :  { %v104_v26 = vadd.f32 %v166_v18, %v103_v22 }
  0x99   :  { %v117_v31 = vpop.permute.xlu1 %116  ;;  %v57_v32 = vpop.permute.xlu0 %56  ;;  %v114_v36 = vadd.f32 %v113_v30, %v104_v26 }
  0x9a   :  { %v123_v37 = vmul.f32 %v122_v27, %v117_v31  ;;  %v63_v38 = vmul.f32 %v62_v28, %v57_v32 }
  0x9c   :  { %v124_v42 = vadd.f32 %v123_v37, %v114_v36  ;;  %v64_v43 = vadd.f32 %v63_v38, %v54_v39 }
  0x9e   :  { %v67_v40 = vpop.permute.xlu1 %66  ;;  %v127_v41 = vpop.permute.xlu0 %126 }
  0x9f   :  { %v73_v44 = vmul.f32 %v72_v33, %v67_v40  ;;  %v133_v45 = vmul.f32 %v132_v34, %v127_v41 }
  0xa1   :  { %v74_v46 = vadd.f32 %v73_v44, %v64_v43  ;;  %v134_v47 = vadd.f32 %v133_v45, %v124_v42 }
  0xa3   :  { %vm75_vm1 = vcmp.gt.f32.partialorder %v74_v46, 0.0  ;;  %v76_v48 = vmul.f32 0.01, %v74_v46  ;;  %vm135_vm2 = vcmp.gt.f32.partialorder %v134_v47, 0.0  ;;  %v136_v49 = vmul.f32 0.01, %v134_v47 }
  0xa5   :  { %v77_v50 = vsel %vm75_vm1, %v74_v46, %v76_v48  ;;  %v137_v51 = vsel %vm135_vm2, %v134_v47, %v136_v49 }
  0xa6   :  { %79 = vst.msk [vmem:[#allocation4] sm:$0xff] %vm78_vm0, %v77_v50  ;;  %139 = vst.msk [vmem:[#allocation4 + $0x8] sm:$0xff] %vm78_vm0, %v137_v51 }
  0xa7   :  { %204 = shalt.err (!%p201_p9)
}
  0xa8   :  { %s205_s13 = scalar_lea.hbm %s289_s4, 256 }
  0xa9   :  { %p206_p10 = scmp.ne.s32.totalorder %s289_s4, %s205_s13  ;;  %p209_p11 = scmp.lt.u32.totalorder %s205_s13, %s289_s4 }
  0xab   :  { %p211_p12 = pnand %p209_p11, %p206_p10 }
  0xad   :  { %214 = shalt.err (!%p211_p12)
}
  0xae   :  { %s225_s18 = smov 128   ;;  %s226_s19 = smov 8  }
  0xaf   :  { %151 = dma.vmem_to_hbm [thread:$0]  %s146_s9, 256, %s289_s4, [#allocation5], %s225_s18, %s225_s18, %s226_s19  }
  0xb0   :  { %217 = dma.done.wait [#allocation5], 256  }
  0xb1   :  { %218 = vsyncadd [#allocation5], 4294967040 }
  0xb2   :  { %155 = vsyncpa [#allocation5], 1 }

</bundles_post_ra>
